<compile_context>
chip_gen: v7x
topology: tpu7x:2x2x1
jax: 0.10.0
libtpu: 0.0.40
codegen_flags: <defaults>
</compile_context>

<pallas_src>
import functools
import math

import jax
import jax.numpy as jnp
from jax.experimental import pallas as pl
from jax.experimental.pallas import tpu as pltpu


def _round_up(x, m):
    return (x + m - 1) // m * m


def _mlp_kernel(n_layers, approx_sigmoid, *refs):
    """refs = (x_ref, w0, b0, ..., w_{L-1}, b_{L-1}, out_ref).

    Hidden weights w_i are stored transposed (in_i, out_i), biases (1, out_i).
    The last weight is the PyTorch row (1, in_last), its bias is (1, 1).
    x_ref block: (TB, in_0).  out_ref block: (1, TB)  -- lane-dense.
    """
    x_ref = refs[0]
    out_ref = refs[-1]
    p = refs[1:-1]

    y = x_ref[...]                                        # (TB, in_0)

    # Hidden layers: MXU matmul with f32 accumulation, bias + ReLU on the VPU,
    # recast to the parameter dtype (bf16 keeps the MXU in its native mode).
    for i in range(n_layers - 1):
        w = p[2 * i][...]                                 # (in_i, out_i)
        b = p[2 * i + 1][...].astype(jnp.float32)         # (1, out_i)
        y = jnp.dot(y, w, preferred_element_type=jnp.float32)
        y = jnp.maximum(y + b, 0.0)
        y = y.astype(w.dtype)

    # Final Linear(., 1): contract the feature axis of both operands so the
    # result is produced directly as a lane-dense (1, TB) row (no (K,1)
    # degenerate output layout, no masked 1-wide stores).
    w_last = p[-2][...]                                   # (1, in_last)
    b_last = p[-1][...].astype(jnp.float32)               # (1, 1)
    z = jax.lax.dot_general(
        w_last, y,
        dimension_numbers=(((1,), (1,)), ((), ())),
        preferred_element_type=jnp.float32,
    )                                                     # (1, TB)
    z = z + b_last

    # Numerically stable sigmoid: exp -> EUP, reciprocal -> EUP (approx) slot.
    e = jnp.exp(-jnp.abs(z))
    inv = pl.reciprocal(1.0 + e, approx=approx_sigmoid)
    sig = jnp.where(z >= 0.0, inv, e * inv)
    out_ref[...] = sig.astype(out_ref.dtype)


def linear_binary_forward(x, weights, biases, *, block_batch=512,
                          approx_sigmoid=True, interpret=False):
    """Fused forward pass of LinearBinaryModel.

    x:       (B, in_features)
    weights: PyTorch-layout weights, weights[i] shape (out_i, in_i); out_last=1
    biases:  biases[i] shape (out_i,)
    Returns  (B, 1) probabilities in x.dtype.
    """
    assert len(weights) == len(biases) >= 1
    n_layers = len(weights)
    batch, d_in = x.shape
    assert weights[0].shape[1] == d_in
    assert weights[-1].shape[0] == 1, "last layer must have out_features == 1"

    # Kernel-side parameter layout (tiny one-time layout ops outside the kernel).
    flat_params = []
    for i, (w, b) in enumerate(zip(weights, biases)):
        if i < n_layers - 1:
            flat_params.append(w.T)                       # (in_i, out_i)
        else:
            flat_params.append(w.reshape(1, -1))          # (1, in_last)
        flat_params.append(b.reshape(1, -1))              # (1, out_i)

    # Batch tile: multiple of 128 (lane-dense unmasked stores); large tiles
    # amortize the ~0.35us per-step overhead while staying far below the
    # 64 MiB (v7x) VMEM budget even with double buffering.
    tb = min(_round_up(block_batch, 128), _round_up(batch, 128))
    b_pad = _round_up(batch, tb)
    if b_pad != batch:
        x = jnp.pad(x, ((0, b_pad - batch), (0, 0)))
    num_tiles = b_pad // tb

    # Advisory cost estimate for the XLA scheduler.
    dims = [d_in] + [w.shape[0] for w in weights]
    flops = 2 * b_pad * sum(dims[i] * dims[i + 1] for i in range(n_layers))
    param_bytes = sum(int(p.size) * p.dtype.itemsize for p in flat_params)
    bytes_accessed = (int(x.size) * x.dtype.itemsize      # stream x in
                      + b_pad * x.dtype.itemsize          # stream out
                      + param_bytes)                      # weights once
    cost = pl.CostEstimate(flops=flops, transcendentals=b_pad,
                           bytes_accessed=bytes_accessed)

    x_spec = pl.BlockSpec((tb, d_in), lambda i: (i, 0))
    # Constant index_map -> weights/biases stay resident across all batch tiles.
    param_specs = [pl.BlockSpec(p.shape, lambda i: (0, 0)) for p in flat_params]
    out_spec = pl.BlockSpec((1, tb), lambda i: (0, i))

    kernel = functools.partial(_mlp_kernel, n_layers, approx_sigmoid)
    out = pl.pallas_call(
        kernel,
        out_shape=jax.ShapeDtypeStruct((1, b_pad), x.dtype),
        grid=(num_tiles,),
        in_specs=[x_spec] + param_specs,
        out_specs=out_spec,
        compiler_params=pltpu.CompilerParams(
            dimension_semantics=("parallel",),
            vmem_limit_bytes=48 * 1024 * 1024,
        ),
        cost_estimate=cost,
        interpret=interpret,
    )(x, *flat_params)

    return out[0, :batch].reshape(batch, 1)


def init_params(key, sizes, dtype=jnp.float32):
    """PyTorch-style nn.Linear init; weights in (out, in) layout, biases (out,)."""
    dims = list(sizes) + [1]
    weights, biases = [], []
    for i in range(len(dims) - 1):
        fan_in, fan_out = dims[i], dims[i + 1]
        key, kw, kb = jax.random.split(key, 3)
        bound = 1.0 / math.sqrt(fan_in)
        w = jax.random.uniform(kw, (fan_out, fan_in), jnp.float32, -bound, bound)
        b = jax.random.uniform(kb, (fan_out,), jnp.float32, -bound, bound)
        weights.append(w.astype(dtype))
        biases.append(b.astype(dtype))
    return weights, biases


def reference_forward(x, weights, biases):
    """Pure-JAX (f32) reference of LinearBinaryModel.forward."""
    y = x.astype(jnp.float32)
    n = len(weights)
    for i, (w, b) in enumerate(zip(weights, biases)):
        y = y @ w.astype(jnp.float32).T + b.astype(jnp.float32)
        if i < n - 1:
            y = jnp.maximum(y, 0.0)
    return jax.nn.sigmoid(y)


if __name__ == "__main__":
    # LinearBinaryModel(32, 16): Linear(32,16) -> ReLU -> Linear(16,1) -> sigmoid
    sizes = (32, 16)
    key = jax.random.PRNGKey(0)
    key, kx = jax.random.split(key)

    x = jax.random.normal(kx, (8, sizes[0]), jnp.float32)
    weights, biases = init_params(key, sizes, dtype=jnp.float32)

    # 1) f32, exact-math sigmoid path: tight check against the reference.
    out = jax.block_until_ready(
        linear_binary_forward(x, weights, biases, approx_sigmoid=False))
    ref = reference_forward(x, weights, biases)
    assert out.shape == (8, 1), out.shape
    assert jnp.allclose(out, ref, atol=1e-5, rtol=1e-5), (
        f"f32 mismatch: {float(jnp.max(jnp.abs(out - ref)))}")

    # 2) Multi-tile grid + batch padding (batch not a multiple of the tile),
    #    approximate EUP reciprocal in the sigmoid.
    key, kx2 = jax.random.split(key)
    x2 = jax.random.normal(kx2, (1000, sizes[0]), jnp.float32)
    out2 = jax.block_until_ready(
        linear_binary_forward(x2, weights, biases, block_batch=512))
    ref2 = reference_forward(x2, weights, biases)
    assert out2.shape == (1000, 1), out2.shape
    assert jnp.allclose(out2, ref2, atol=1e-2), (
        f"tiled mismatch: {float(jnp.max(jnp.abs(out2 - ref2)))}")

    # 3) bf16 weights/activations with f32 MXU accumulation.
    wb = [w.astype(jnp.bfloat16) for w in weights]
    bb = [b.astype(jnp.bfloat16) for b in biases]
    out3 = jax.block_until_ready(
        linear_binary_forward(x.astype(jnp.bfloat16), wb, bb))
    assert out3.shape == (8, 1), out3.shape
    assert jnp.allclose(out3.astype(jnp.float32), ref, atol=3e-2), (
        f"bf16 mismatch: {float(jnp.max(jnp.abs(out3.astype(jnp.float32) - ref)))}")

    print("KERNEL_OK")
</pallas_src>

<mosaic_0001>
module attributes {stable_mosaic.version = 11 : i64} {
  func.func @_mlp_kernel(%arg0: i32, %arg1: memref<128x32xf32, #tpu.memory_space<vmem>>, %arg2: memref<32x16xf32, #tpu.memory_space<vmem>>, %arg3: memref<1x16xf32, #tpu.memory_space<vmem>>, %arg4: memref<1x16xf32, #tpu.memory_space<vmem>>, %arg5: memref<1x1xf32, #tpu.memory_space<vmem>>, %arg6: memref<1x128xf32, #tpu.memory_space<vmem>>) attributes {dimension_semantics = [#tpu.dimension_semantics<parallel>], iteration_bounds = array<i64: 1>, scalar_prefetch = 0 : i64, scratch_operands = 0 : i64, tpu.core_type = #tpu.core_type<tc>, window_params = [{transform_indices = @transform_0, window_bounds = array<i64: 128, 32>}, {pipeline_mode = #tpu.pipeline_mode<synchronous>, transform_indices = @transform_1, window_bounds = array<i64: 32, 16>}, {pipeline_mode = #tpu.pipeline_mode<synchronous>, transform_indices = @transform_2, window_bounds = array<i64: 1, 16>}, {pipeline_mode = #tpu.pipeline_mode<synchronous>, transform_indices = @transform_3, window_bounds = array<i64: 1, 16>}, {pipeline_mode = #tpu.pipeline_mode<synchronous>, transform_indices = @transform_4, window_bounds = array<i64: 1, 1>}, {transform_indices = @transform_5, window_bounds = array<i64: 1, 128>}]} {
    %c0 = arith.constant 0 : index
    %c0_0 = arith.constant 0 : index
    %0 = vector.load %arg1[%c0, %c0_0] : memref<128x32xf32, #tpu.memory_space<vmem>>, vector<128x32xf32>
    %c0_1 = arith.constant 0 : index
    %c0_2 = arith.constant 0 : index
    %1 = vector.load %arg2[%c0_1, %c0_2] : memref<32x16xf32, #tpu.memory_space<vmem>>, vector<32x16xf32>
    %c0_3 = arith.constant 0 : index
    %c0_4 = arith.constant 0 : index
    %2 = vector.load %arg3[%c0_3, %c0_4] : memref<1x16xf32, #tpu.memory_space<vmem>>, vector<1x16xf32>
    %cst = arith.constant dense<0.000000e+00> : vector<128x16xf32>
    %3 = tpu.matmul %0, %1, %cst {dimension_numbers = #tpu.dot_dimension_numbers<[1], [0], [0], [1], [0, 0, 1, 1], [], []>} : vector<128x32xf32>, vector<32x16xf32>, vector<128x16xf32> -> vector<128x16xf32>
    %4 = vector.broadcast %2 : vector<1x16xf32> to vector<128x16xf32>
    %5 = arith.addf %3, %4 : vector<128x16xf32>
    %cst_5 = arith.constant 0.000000e+00 : f32
    %6 = vector.broadcast %cst_5 : f32 to vector<128x16xf32>
    %7 = arith.maximumf %5, %6 : vector<128x16xf32>
    %c0_6 = arith.constant 0 : index
    %c0_7 = arith.constant 0 : index
    %8 = vector.load %arg4[%c0_6, %c0_7] : memref<1x16xf32, #tpu.memory_space<vmem>>, vector<1x16xf32>
    %c0_8 = arith.constant 0 : index
    %c0_9 = arith.constant 0 : index
    %9 = vector.load %arg5[%c0_8, %c0_9] : memref<1x1xf32, #tpu.memory_space<vmem>>, vector<1x1xf32>
    %cst_10 = arith.constant dense<0.000000e+00> : vector<1x128xf32>
    %10 = tpu.matmul %8, %7, %cst_10 {dimension_numbers = #tpu.dot_dimension_numbers<[1], [1], [0], [0], [0, 0, 1, 0], [], []>} : vector<1x16xf32>, vector<128x16xf32>, vector<1x128xf32> -> vector<1x128xf32>
    %11 = vector.broadcast %9 : vector<1x1xf32> to vector<1x128xf32>
    %12 = arith.addf %10, %11 : vector<1x128xf32>
    %13 = math.absf %12 : vector<1x128xf32>
    %cst_11 = arith.constant 0.000000e+00 : f32
    %14 = vector.broadcast %cst_11 : f32 to vector<1x128xf32>
    %15 = arith.subf %14, %13 : vector<1x128xf32>
    %16 = math.exp %15 : vector<1x128xf32>
    %cst_12 = arith.constant 1.000000e+00 : f32
    %17 = vector.broadcast %cst_12 : f32 to vector<1x128xf32>
    %18 = arith.addf %17, %16 : vector<1x128xf32>
    %19 = tpu.reciprocal %18 : vector<1x128xf32> -> vector<1x128xf32>
    %cst_13 = arith.constant 0.000000e+00 : f32
    %20 = vector.broadcast %cst_13 : f32 to vector<1x128xf32>
    %21 = arith.cmpf oge, %12, %20 : vector<1x128xf32>
    %22 = arith.mulf %16, %19 : vector<1x128xf32>
    %23 = arith.select %21, %19, %22 : vector<1x128xi1>, vector<1x128xf32>
    %c0_14 = arith.constant 0 : index
    %c0_15 = arith.constant 0 : index
    %24 = vector.load %arg6[%c0_14, %c0_15] : memref<1x128xf32, #tpu.memory_space<vmem>>, vector<1x128xf32>
    tpu.vector_store %arg6[%c0_14, %c0_15], %23 {strides = array<i32>} : memref<1x128xf32, #tpu.memory_space<vmem>>, vector<1x128xf32>,
    return
  }
  func.func @transform_0(%arg0: i32) -> (i32, i32) {
    %c0_i32 = arith.constant 0 : i32
    %c0_i32_0 = arith.constant 0 : i32
    return %arg0, %c0_i32 : i32, i32
  }
  func.func @transform_1(%arg0: i32) -> (i32, i32) {
    %c0_i32 = arith.constant 0 : i32
    %c0_i32_0 = arith.constant 0 : i32
    %c0_i32_1 = arith.constant 0 : i32
    return %c0_i32, %c0_i32_0 : i32, i32
  }
  func.func @transform_2(%arg0: i32) -> (i32, i32) {
    %c0_i32 = arith.constant 0 : i32
    %c0_i32_0 = arith.constant 0 : i32
    %c0_i32_1 = arith.constant 0 : i32
    return %c0_i32, %c0_i32_0 : i32, i32
  }
  func.func @transform_3(%arg0: i32) -> (i32, i32) {
    %c0_i32 = arith.constant 0 : i32
    %c0_i32_0 = arith.constant 0 : i32
    %c0_i32_1 = arith.constant 0 : i32
    return %c0_i32, %c0_i32_0 : i32, i32
  }
  func.func @transform_4(%arg0: i32) -> (i32, i32) {
    %c0_i32 = arith.constant 0 : i32
    %c0_i32_0 = arith.constant 0 : i32
    %c0_i32_1 = arith.constant 0 : i32
    return %c0_i32, %c0_i32_0 : i32, i32
  }
  func.func @transform_5(%arg0: i32) -> (i32, i32) {
    %c0_i32 = arith.constant 0 : i32
    %c0_i32_0 = arith.constant 0 : i32
    return %c0_i32, %arg0 : i32, i32
  }
}

</mosaic_0001>

<bundles_post_ra>
// kernel: tpu_custom_call.1
= control target key start
LH: loop header
LB: loop body
LE: loop exit
PB: predicated region body
PF: predicated region fallthrough
CT: control target
= control target key end

     0   :  { %s792_s0 = inlined_call_operand.vmem [shape: f32[128,32], index: 0, kind: input, shape index: {}]   ;;  %s793_s1 = inlined_call_operand.vmem [shape: f32[32,16], index: 1, kind: input, shape index: {}]   ;;  %s794_s2 = inlined_call_operand.vmem [shape: f32[1,16], index: 2, kind: input, shape index: {}]   ;;  %s795_s3 = inlined_call_operand.vmem [shape: f32[1,16], index: 3, kind: input, shape index: {}]   ;;  %s796_s4 = inlined_call_operand.<no memory space> [shape: f32[1,1], index: 4, kind: input, shape index: {}]   ;;  %s797_s5 = inlined_call_operand.hbm [shape: f32[1,128], index: 5, kind: output, shape index: {}]  }
   0x1   :  { %v10_v0 = vstv %s796_s4 }
   0x2   :  { %11 = vst [vmem:[#allocation2] sm:$0x1] %v10_v0 }
   0x3   :  { %v39_v1 = vld [vmem:[%s793_s1] sm:$0xff]  ;;  %v40_v2 = vld [vmem:[%s793_s1 + $0x8] sm:$0xff]  ;;  %v41_v3 = vld [vmem:[%s793_s1 + $0x10] sm:$0xff]  ;;  %vm50_vm0 = vcmask 261120  }
   0x4   :  { %v555_v4 = vpack.c.bf16 %v40_v2, %v39_v1  ;;  %v42_v5 = vld [vmem:[%s793_s1 + $0x18] sm:$0xff]  ;;  %v23_v6 = vld [vmem:[%s792_s0] sm:$0xff] }
   0x5   :  { %v559_v7 = vpack.c.bf16 %v42_v5, %v41_v3  ;;  %496 = vmatprep.mubr.msk.f32.mxu0 %vm50_vm0, %v23_v6 }
   0x6   :  { %556 = vmatprep.subr.bf16.mxu0 %v555_v4 }
   0x7   :  { %558 = vmatpush3.bf16.msra.mxu0 %v555_v4 }
   0x8   :  { %560 = vmatprep.subr.bf16.mxu0 %v559_v7 }
   0x9   :  { %12 = vsyncpa [#allocation4], 0  ;;  %v24_v8 = vld [vmem:[%s792_s0 + $0x8] sm:$0xff]  ;;  %v25_v9 = vld [vmem:[%s792_s0 + $0x10] sm:$0xff]  ;;  %v629_v23 = vmov 0.0|0.0   ;;  %vm630_vm1 = vmmov 0  }
   0xa   :  { %v26_v10 = vld [vmem:[%s792_s0 + $0x18] sm:$0xff]  ;;  %v27_v11 = vld [vmem:[%s792_s0 + $0x20] sm:$0xff]  ;;  %v28_v12 = vld [vmem:[%s792_s0 + $0x28] sm:$0xff]  ;;  %563 = vmatprep.subr.bf16.mxu1 %v629_v23  ;;  %v631_v24 = vmov 0.0   ;;  %v632_v26 = vmov 0   ;;  %vm271_vm2 = vcmask 130048  }
   0xb   :  { %562 = vmatpush3.bf16.msra.mxu0 %v559_v7  ;;  %v29_v13 = vld [vmem:[%s792_s0 + $0x30] sm:$0xff]  ;;  %v30_v14 = vld [vmem:[%s792_s0 + $0x38] sm:$0xff]  ;;  %v31_v15 = vld [vmem:[%s792_s0 + $0x40] sm:$0xff]  ;;  %552 = vmatprep.mubr.msk.f32.mxu1 %vm630_vm1, %v631_v24  ;;  %s633_s8 = smov [#allocation3]  }
   0xc   :  { %v32_v16 = vld [vmem:[%s792_s0 + $0x48] sm:$0xff]  ;;  %v33_v17 = vld [vmem:[%s792_s0 + $0x50] sm:$0xff]  ;;  %v34_v18 = vld [vmem:[%s792_s0 + $0x58] sm:$0xff]  ;;  %600 = vset.pattern.permute.xlu0 %v632_v26  ;;  %s409_s9 = sshll.u32 %s633_s8, 4  ;;  %s410_s9 = int_to_ptr.vmem [resolvable:$true] %s409_s9 }
   0xd   :  { %v35_v19 = vld [vmem:[%s792_s0 + $0x60] sm:$0xff]  ;;  %v36_v20 = vld [vmem:[%s792_s0 + $0x68] sm:$0xff]  ;;  %v37_v21 = vld [vmem:[%s792_s0 + $0x70] sm:$0xff]  ;;  %s609_s10 = scalar_lea.vmem %s410_s9, 32  ;;  %p610_p1 = scmp.lt.s32.totalorder %s410_s9, %s410_s9 }
   0xe   :  { %497 = vmatmul.mubr.msk.f32.vlgmr.msra.gmra.mrb[0].mxu0 %vm50_vm0, %v24_v8  ;;  %v38_v22 = vld [vmem:[%s792_s0 + $0x78] sm:$0xff]  ;;  %v261_v25 = vld [vmem:[#allocation2] sm:$0x1]  ;;  %vm749_vm3 = vmpackc.low %vm271_vm2, %vm271_vm2 }
   0xf   :  { %499 = vmatprep.mubr.msk.f32.mxu0 %vm50_vm0, %v25_v9  ;;  %264 = vperm.xlu0 %600, %v261_v25   ;;  %v417_v27 = vld [vmem:[%s794_s2] ss:$0 sm:$0xff] }
  0x12   :  { %500 = vmatmul.mubr.msk.f32.gmra.mrb[2].mxu0 %vm50_vm0, %v26_v10 }
  0x13   :  { %502 = vmatprep.mubr.msk.f32.mxu0 %vm50_vm0, %v27_v11 }
  0x16   :  { %503 = vmatmul.mubr.msk.f32.gmra.mrb[4].mxu0 %vm50_vm0, %v28_v12 }
  0x17   :  { %505 = vmatprep.mubr.msk.f32.mxu0 %vm50_vm0, %v29_v13 }
  0x1a   :  { %506 = vmatmul.mubr.msk.f32.gmra.mrb[6].mxu0 %vm50_vm0, %v30_v14 }
  0x1b   :  { %508 = vmatprep.mubr.msk.f32.mxu0 %vm50_vm0, %v31_v15 }
  0x1e   :  { %509 = vmatmul.mubr.msk.f32.gmra.mrb[8].mxu0 %vm50_vm0, %v32_v16 }
  0x1f   :  { %511 = vmatprep.mubr.msk.f32.mxu0 %vm50_vm0, %v33_v17 }
  0x22   :  { %512 = vmatmul.mubr.msk.f32.gmra.mrb[10].mxu0 %vm50_vm0, %v34_v18 }
  0x23   :  { %514 = vmatprep.mubr.msk.f32.mxu0 %vm50_vm0, %v35_v19 }
  0x26   :  { %515 = vmatmul.mubr.msk.f32.gmra.mrb[12].mxu0 %vm50_vm0, %v36_v20 }
  0x27   :  { %517 = vmatprep.mubr.msk.f32.mxu0 %vm50_vm0, %v37_v21  ;;  %v260_v21 = vld [vmem:[%s795_s3] sm:$0x1]  ;;  %s605_s3 = scalar_lea.vmem %s410_s9, 16 }
  0x28   :  { %p606_p0 = scmp.ne.s32.totalorder %s410_s9, %s605_s3  ;;  %p611_p2 = scmp.lt.s32.totalorder %s609_s10, %s605_s3 }
  0x2a   :  { %518 = vmatmul.mubr.msk.f32.gmra.mrb[14].mxu0 %vm50_vm0, %v38_v22  ;;  %v267_v22 = vlaneseq  ;;  %p612_p3 = por %p611_p2, %p610_p1 }
  0x2c   :  { %v268_v24 = vshrl.u32 %v267_v22, 7  ;;  %p613_p4 = pnand %p612_p3, %p606_p0 }
  0x2e   :  { %v269_v25 = vsub.s32 0, %v268_v24 }
  0x8e   :  { %v265_v26 = vpop.permute.xlu0 %264 }
  0xe1   :  { %v498_v28 = vpop.f32.mrb[0].mxu0 }
  0xe2   :  { %v171_v29 = vadd.f32 %v498_v28, %v417_v27  ;;  %v165_v30 = vpop.f32.mrb[1].mxu0 }
  0xe3   :  { %v166_v31 = vadd.f32 %v417_v27, %v165_v30 }
  0xe4   :  { %v245_v32 = vmax.f32 %v171_v29, 0.0 }
  0xe5   :  { %v244_v33 = vmax.f32 %v166_v31, 0.0  ;;  %v501_v34 = vpop.f32.mrb[2].mxu0 }
  0xe6   :  { %v181_v35 = vadd.f32 %v501_v34, %v417_v27  ;;  %v175_v36 = vpop.f32.mrb[3].mxu0 }
  0xe7   :  { %v564_v38 = vpack.c.bf16 %v245_v32, %v244_v33  ;;  %v176_v39 = vadd.f32 %v417_v27, %v175_v36 }
  0xe8   :  { %v247_v40 = vmax.f32 %v181_v35, 0.0 }
  0xe9   :  { %v246_v41 = vmax.f32 %v176_v39, 0.0  ;;  %566 = vmatpush3.bf16.xpose.msk.msra.mxu1 %vm749_vm3, %v564_v38  ;;  %v504_v42 = vpop.f32.mrb[4].mxu0 }
  0xea   :  { %v191_v43 = vadd.f32 %v504_v42, %v417_v27  ;;  %567 = vmatprep.subr.bf16.mxu1 %v629_v23  ;;  %v185_v44 = vpop.f32.mrb[5].mxu0 }
  0xeb   :  { %v568_v45 = vpack.c.bf16 %v247_v40, %v246_v41  ;;  %v186_v46 = vadd.f32 %v417_v27, %v185_v44 }
  0xec   :  { %v249_v47 = vmax.f32 %v191_v43, 0.0 }
  0xed   :  { %v248_v48 = vmax.f32 %v186_v46, 0.0  ;;  %v507_v49 = vpop.f32.mrb[6].mxu0 }
  0xee   :  { %v201_v50 = vadd.f32 %v507_v49, %v417_v27  ;;  %v195_v51 = vpop.f32.mrb[7].mxu0 }
  0xef   :  { %v572_v52 = vpack.c.bf16 %v249_v47, %v248_v48  ;;  %v196_v53 = vadd.f32 %v417_v27, %v195_v51 }
  0xf0   :  { %v251_v54 = vmax.f32 %v201_v50, 0.0 }
  0xf1   :  { %570 = vmatpush3.bf16.xpose.msk.msra.mxu1 %vm749_vm3, %v568_v45  ;;  %v250_v55 = vmax.f32 %v196_v53, 0.0  ;;  %v510_v56 = vpop.f32.mrb[8].mxu0 }
  0xf2   :  { %571 = vmatprep.subr.bf16.mxu1 %v629_v23  ;;  %v211_v57 = vadd.f32 %v510_v56, %v417_v27  ;;  %v205_v58 = vpop.f32.mrb[9].mxu0 }
  0xf3   :  { %v576_v59 = vpack.c.bf16 %v251_v54, %v250_v55  ;;  %v206_v60 = vadd.f32 %v417_v27, %v205_v58 }
  0xf4   :  { %v253_v61 = vmax.f32 %v211_v57, 0.0 }
  0xf5   :  { %v252_v62 = vmax.f32 %v206_v60, 0.0  ;;  %v513_v63 = vpop.f32.mrb[10].mxu0 }
  0xf6   :  { %v221_v0 = vadd.f32 %v513_v63, %v417_v27  ;;  %v215_v1 = vpop.f32.mrb[11].mxu0 }
  0xf7   :  { %v580_v2 = vpack.c.bf16 %v253_v61, %v252_v62  ;;  %v216_v3 = vadd.f32 %v417_v27, %v215_v1 }
  0xf8   :  { %v255_v4 = vmax.f32 %v221_v0, 0.0 }
  0xf9   :  { %574 = vmatpush3.bf16.xpose.msk.msra.mxu1 %vm749_vm3, %v572_v52  ;;  %v254_v5 = vmax.f32 %v216_v3, 0.0  ;;  %v516_v6 = vpop.f32.mrb[12].mxu0 }
  0xfa   :  { %575 = vmatprep.subr.bf16.mxu1 %v629_v23  ;;  %v231_v7 = vadd.f32 %v516_v6, %v417_v27  ;;  %v225_v8 = vpop.f32.mrb[13].mxu0 }
  0xfb   :  { %v584_v9 = vpack.c.bf16 %v255_v4, %v254_v5  ;;  %v226_v10 = vadd.f32 %v417_v27, %v225_v8 }
  0xfc   :  { %v257_v11 = vmax.f32 %v231_v7, 0.0 }
  0xfd   :  { %v256_v12 = vmax.f32 %v226_v10, 0.0  ;;  %v519_v13 = vpop.f32.mrb[14].mxu0 }
  0xfe   :  { %v241_v14 = vadd.f32 %v519_v13, %v417_v27  ;;  %v235_v15 = vpop.f32.mrb[15].mxu0 }
  0xff   :  { %v588_v16 = vpack.c.bf16 %v257_v11, %v256_v12  ;;  %v236_v17 = vadd.f32 %v417_v27, %v235_v15  ;;  %v270_v27 = vrot.slane %v265_v26, %v269_v25 }
 0x100   :  { %v259_v18 = vmax.f32 %v241_v14, 0.0 }
 0x101   :  { %578 = vmatpush3.bf16.xpose.msk.msra.mxu1 %vm749_vm3, %v576_v59  ;;  %v258_v19 = vmax.f32 %v236_v17, 0.0 }
 0x102   :  { %579 = vmatprep.subr.bf16.mxu1 %v629_v23 }
 0x103   :  { %v592_v20 = vpack.c.bf16 %v259_v18, %v258_v19 }
 0x109   :  { %582 = vmatpush3.bf16.xpose.msk.msra.mxu1 %vm749_vm3, %v580_v2 }
 0x10a   :  { %583 = vmatprep.subr.bf16.mxu1 %v629_v23 }
 0x111   :  { %586 = vmatpush3.bf16.xpose.msk.msra.mxu1 %vm749_vm3, %v584_v9 }
 0x112   :  { %587 = vmatprep.subr.bf16.mxu1 %v629_v23 }
 0x119   :  { %590 = vmatpush3.bf16.xpose.msk.msra.mxu1 %vm749_vm3, %v588_v16 }
 0x11a   :  { %591 = vmatprep.subr.bf16.mxu1 %v629_v23 }
 0x121   :  { %594 = vmatpush3.bf16.xpose.msk.msra.mxu1 %vm749_vm3, %v592_v20 }
 0x128   :  { %553 = vmatmul.mubr.msk.f32.vlgmr.msra.gmra.mrb[0].mxu1 %vm271_vm2, %v260_v21 }
 0x1fb   :  { %v389_v28 = vpop.f32.mrb[0].mxu1 }
 0x1fc   :  { %v390_v29 = vadd.f32 %v389_v28, %v270_v27  ;;  %v554_v30 = vpop.f32.mrb[1].mxu1 }
 0x1fe   :  { %v393_v31 = vand.u32 2147483647, %v390_v29  ;;  %vm399_vm4 = vcmp.ge.f32.partialorder %v390_v29, 0.0 }
 0x200   :  { %v394_v32 = vsub.f32 0.0, %v393_v31 }
 0x202   :  { %v395_v23 = vmul.f32 1.442695, %v394_v32 }
 0x204   :  { %601 = vpow2.f32 %v395_v23 }
 0x20e   :  { %v602_v33 = vpop.eup %601 }
 0x20f   :  { %v397_v34 = vadd.f32 1.0, %v602_v33 }
 0x211   :  { %603 = vrcp.f32 %v397_v34 }
 0x21b   :  { %v604_v35 = vpop.eup %603 }
 0x21c   :  { %v400_v36 = vmul.f32 %v604_v35, %v602_v33 }
 0x21e   :  { %v401_v37 = vsel %vm399_vm4, %v604_v35, %v400_v36 }
 0x21f   :  { %402 = vst [vmem:[#allocation3] sm:$0x1] %v401_v37 }
 0x220   :  { %616 = shalt.err (!%p613_p4)
}
 0x221   :  { %s617_s13 = scalar_lea.hbm %s797_s5, 16 }
 0x222   :  { %p618_p5 = scmp.ne.s32.totalorder %s797_s5, %s617_s13  ;;  %p621_p6 = scmp.lt.u32.totalorder %s617_s13, %s797_s5 }
 0x224   :  { %p623_p7 = pnand %p621_p6, %p618_p5 }
 0x226   :  { %626 = shalt.err (!%p623_p7)
}
 0x227   :  { %412 = dma.vmem_to_hbm [thread:$0]  %s410_s9, 16, %s797_s5, [#allocation4]  }
 0x228   :  { %627 = dma.done.wait [#allocation4], 16  }
 0x229   :  { %628 = vsyncadd [#allocation4], 4294967280 }
 0x22a   :  { %416 = vsyncpa [#allocation4], 1 }

</bundles_post_ra>
